<compile_context>
chip_gen: v5e
topology: v5e:2x2
jax: 0.10.0
libtpu: 0.0.40
codegen_flags: <defaults>
</compile_context>

<pallas_src>
import jax
import jax.numpy as jnp
from jax.experimental import pallas as pl
from jax.experimental.pallas import tpu as pltpu


def _make_kernel(decision_focused: bool):
    """Builds the fused kernel for one static branch of the module."""
    sign = -1.0 if decision_focused else 1.0
    fill = 1e8 if decision_focused else -1e8

    def kernel(markov_ref,   # (tb, N) any float dtype
               wb_ref,       # (2, N) f32: row 0 = conv weight, row 1 = conv bias
               mask_ref,     # (tb, N) int or float (nonzero == masked)
               out_ref):     # (tb, N) f32
        # diagonal(Conv1d(1, N, 1)(x_markov[:, None, :]))  ==  per-node affine.
        x = markov_ref[...].astype(jnp.float32)              # (tb, N)
        y = x * wb_ref[0:1, :] + wb_ref[1:2, :]               # broadcast over batch rows

        # Numerically stable log_softmax along the node (lane) axis.
        y_max = jnp.max(y, axis=1, keepdims=True)              # XLU lane reduce
        z = y - y_max
        lse = jnp.log(jnp.sum(jnp.exp(z), axis=1, keepdims=True))  # EUP exp/log
        logsm = sign * (z - lse)

        # masked_fill(x_mask.bool(), +/-1e8)
        out_ref[...] = jnp.where(mask_ref[...] != 0, jnp.float32(fill), logsm)

    return kernel


def only_markov_convolution(x, x_dist, x_features, x_markov, x_week, x_mask,
                            params, *, decision_focused=False, batch_tile=256):
    """Forward pass of OnlyMarkovConvolution.

    x, x_dist, x_features, x_week are accepted for signature parity with the
    PyTorch module but are not used by its forward (only x_features.shape[0]
    is read and then discarded), so they are never DMA'd into the kernel.
    """
    del x, x_dist, x_features, x_week  # unused by the PyTorch forward
    B, N = x_markov.shape

    # Pack Conv1d(1, N, 1) weight (N,1,1)->(N,) and bias (N,) into one (2, N) array.
    wb = jnp.stack([params["conv_w"].reshape(N),
                    params["conv_b"].reshape(N)]).astype(jnp.float32)

    # Only bool needs widening (i1 loads are awkward); int/float masks go in as-is.
    mask = x_mask.astype(jnp.int32) if x_mask.dtype == jnp.bool_ else x_mask

    kernel = _make_kernel(bool(decision_focused))
    out_shape = jax.ShapeDtypeStruct((B, N), jnp.float32)

    if B <= batch_tile:
        # Small batch: no grid, whole-array VMEM blocks, single kernel invocation.
        return pl.pallas_call(kernel, out_shape=out_shape)(x_markov, wb, mask)

    # Large batch: tile over B and mark it parallel (the row-wise log-softmax is
    # independent across batch rows, so megacore sharding is safe).
    tb = batch_tile
    return pl.pallas_call(
        kernel,
        out_shape=out_shape,
        grid=(pl.cdiv(B, tb),),
        in_specs=[
            pl.BlockSpec((tb, N), lambda i: (i, 0)),   # x_markov
            pl.BlockSpec((2, N), lambda i: (0, 0)),    # packed conv weight/bias
            pl.BlockSpec((tb, N), lambda i: (i, 0)),   # mask
        ],
        out_specs=pl.BlockSpec((tb, N), lambda i: (i, 0)),
        compiler_params=pltpu.CompilerParams(
            dimension_semantics=("parallel",)),
    )(x_markov, wb, mask)


def _reference(x_markov, x_mask, w, b, decision_focused=False):
    """Pure-JAX reference mirroring the PyTorch forward."""
    y = x_markov * w[None, :] + b[None, :]
    logsm = jax.nn.log_softmax(y, axis=1)
    if decision_focused:
        return jnp.where(x_mask != 0, 1e8, -logsm)
    return jnp.where(x_mask != 0, -1e8, logsm)


if __name__ == "__main__":
    # Small shapes consistent with the module (nnodes chosen lane-aligned = 128;
    # the module default 74 also works since full-array blocks are used at small B).
    B = 8        # batch (n_rows)
    L = 8        # lookback_period (unused by forward)
    N = 128      # nnodes
    F = 2        # n_features (unused by forward)
    NWEEK = 7    # nweekdays (unused by forward)

    key = jax.random.PRNGKey(0)
    keys = jax.random.split(key, 8)

    params = {
        # Conv1d(1, N, 1): weight (N, 1, 1), bias (N,)
        "conv_w": jax.random.normal(keys[0], (N, 1, 1), jnp.float32) * 0.1,
        "conv_b": jax.random.normal(keys[1], (N,), jnp.float32) * 0.1,
    }

    x = jax.random.normal(keys[2], (B, L, N), jnp.float32)        # unused by forward
    x_dist = jax.random.uniform(keys[3], (N,), jnp.float32)       # unused by forward
    x_features = jax.random.normal(keys[4], (B, F), jnp.float32)  # only .shape[0] read
    x_markov = jax.random.normal(keys[5], (B, N), jnp.float32)
    x_week = jax.random.randint(keys[6], (B,), 0, NWEEK)          # unused by forward
    x_mask = (jax.random.uniform(keys[7], (B, N)) < 0.1).astype(jnp.int32)

    w_flat = params["conv_w"].reshape(N)
    b_flat = params["conv_b"]

    # 1) default branch, small-batch (no-grid) path
    out = only_markov_convolution(
        x, x_dist, x_features, x_markov, x_week, x_mask, params)
    out = jax.block_until_ready(out)
    ref = _reference(x_markov, x_mask, w_flat, b_flat, decision_focused=False)
    assert out.shape == (B, N)
    assert jnp.allclose(out, ref, atol=1e-5, rtol=1e-5), "mismatch (default branch)"

    # 2) decision_focused branch
    out_df = only_markov_convolution(
        x, x_dist, x_features, x_markov, x_week, x_mask, params,
        decision_focused=True)
    out_df = jax.block_until_ready(out_df)
    ref_df = _reference(x_markov, x_mask, w_flat, b_flat, decision_focused=True)
    assert jnp.allclose(out_df, ref_df, atol=1e-5, rtol=1e-5), "mismatch (decision_focused)"

    # 3) exercise the batch-tiled (grid) path with (8, 128)-aligned tiles
    B2 = 16
    k2 = jax.random.split(keys[5], 2)
    x_markov2 = jax.random.normal(k2[0], (B2, N), jnp.float32)
    x_mask2 = (jax.random.uniform(k2[1], (B2, N)) < 0.1).astype(jnp.int32)
    x_features2 = jnp.zeros((B2, F), jnp.float32)
    out2 = only_markov_convolution(
        x, x_dist, x_features2, x_markov2, x_week, x_mask2, params,
        batch_tile=8)
    out2 = jax.block_until_ready(out2)
    ref2 = _reference(x_markov2, x_mask2, w_flat, b_flat)
    assert jnp.allclose(out2, ref2, atol=1e-5, rtol=1e-5), "mismatch (tiled path)"

    print("KERNEL_OK")
</pallas_src>

<mosaic_0001>
module attributes {stable_mosaic.version = 11 : i64} {
  func.func @kernel(%arg0: memref<8x128xf32, #tpu.memory_space<vmem>>, %arg1: memref<2x128xf32, #tpu.memory_space<vmem>>, %arg2: memref<8x128xi32, #tpu.memory_space<vmem>>, %arg3: memref<8x128xf32, #tpu.memory_space<vmem>>) attributes {dimension_semantics = [], scalar_prefetch = 0 : i64, scratch_operands = 0 : i64, tpu.core_type = #tpu.core_type<tc>} {
    %c0 = arith.constant 0 : index
    %c0_0 = arith.constant 0 : index
    %0 = vector.load %arg0[%c0, %c0_0] : memref<8x128xf32, #tpu.memory_space<vmem>>, vector<8x128xf32>
    %c0_1 = arith.constant 0 : index
    %c0_2 = arith.constant 0 : index
    %1 = vector.load %arg1[%c0_1, %c0_2] : memref<2x128xf32, #tpu.memory_space<vmem>>, vector<1x128xf32>
    %2 = vector.broadcast %1 : vector<1x128xf32> to vector<8x128xf32>
    %3 = arith.mulf %0, %2 : vector<8x128xf32>
    %c1 = arith.constant 1 : index
    %c0_3 = arith.constant 0 : index
    %4 = vector.load %arg1[%c1, %c0_3] : memref<2x128xf32, #tpu.memory_space<vmem>>, vector<1x128xf32>
    %5 = vector.broadcast %4 : vector<1x128xf32> to vector<8x128xf32>
    %6 = arith.addf %3, %5 : vector<8x128xf32>
    %cst = arith.constant dense<0xFF800000> : vector<8xf32>
    %7 = vector.multi_reduction <maximumf>, %6, %cst [1] : vector<8x128xf32> to vector<8xf32>
    %8 = vector.shape_cast %7 : vector<8xf32> to vector<8x1xf32>
    %9 = vector.broadcast %8 : vector<8x1xf32> to vector<8x128xf32>
    %10 = arith.subf %6, %9 : vector<8x128xf32>
    %11 = math.exp %10 : vector<8x128xf32>
    %cst_4 = arith.constant dense<0.000000e+00> : vector<8xf32>
    %12 = vector.multi_reduction <add>, %11, %cst_4 [1] : vector<8x128xf32> to vector<8xf32>
    %13 = vector.shape_cast %12 : vector<8xf32> to vector<8x1xf32>
    %14 = math.log %13 : vector<8x1xf32>
    %15 = vector.broadcast %14 : vector<8x1xf32> to vector<8x128xf32>
    %16 = arith.subf %10, %15 : vector<8x128xf32>
    %cst_5 = arith.constant 1.000000e+00 : f32
    %17 = vector.broadcast %cst_5 : f32 to vector<8x128xf32>
    %18 = arith.mulf %17, %16 : vector<8x128xf32>
    %c0_6 = arith.constant 0 : index
    %c0_7 = arith.constant 0 : index
    %19 = vector.load %arg2[%c0_6, %c0_7] : memref<8x128xi32, #tpu.memory_space<vmem>>, vector<8x128xi32>
    %c0_i32 = arith.constant 0 : i32
    %20 = vector.broadcast %c0_i32 : i32 to vector<8x128xi32>
    %21 = arith.cmpi ne, %19, %20 : vector<8x128xi32>
    %cst_8 = arith.constant -1.000000e+08 : f32
    %22 = vector.broadcast %cst_8 : f32 to vector<8x128xf32>
    %23 = arith.select %21, %22, %18 : vector<8x128xi1>, vector<8x128xf32>
    %c0_9 = arith.constant 0 : index
    %c0_10 = arith.constant 0 : index
    %24 = vector.load %arg3[%c0_9, %c0_10] : memref<8x128xf32, #tpu.memory_space<vmem>>, vector<8x128xf32>
    tpu.vector_store %arg3[%c0_9, %c0_10], %23 {strides = array<i32>} : memref<8x128xf32, #tpu.memory_space<vmem>>, vector<8x128xf32>,
    return
  }
}

</mosaic_0001>

<bundles_post_ra>
// kernel: tpu_custom_call.1
= control target key start
LH: loop header
LB: loop body
LE: loop exit
PB: predicated region body
PF: predicated region fallthrough
CT: control target
= control target key end

     0   :  { %8 = vsyncpa [#allocation3], 0  ;;  %s243_s0 = inlined_call_operand.hbm [shape: f32[8,128], index: 0, kind: input, shape index: {}]   ;;  %s244_s1 = inlined_call_operand.hbm [shape: f32[2,128], index: 1, kind: input, shape index: {}]   ;;  %s245_s2 = inlined_call_operand.hbm [shape: s32[8,128], index: 2, kind: input, shape index: {}]   ;;  %s246_s3 = inlined_call_operand.hbm [shape: f32[8,128], index: 3, kind: output, shape index: {}]  }
   0x1   :  { %9 = vsyncpa [#allocation6], 0  ;;  %s27_s14 = sshll.u32 %s244_s1, 4  ;;  %s28_s14 = int_to_ptr.hbm [resolvable:$true] %s27_s14 }
   0x2   :  { %10 = vsyncpa [#allocation4], 0  ;;  %s207_s15 = smov [#allocation5]   ;;  %s16_s19 = sshll.u32 %s243_s0, 4  ;;  %s17_s19 = int_to_ptr.hbm [resolvable:$true] %s16_s19 }
   0x3   :  { %s29_s16 = sshll.u32 %s207_s15, 4  ;;  %s208_s20 = smov [#allocation2]   ;;  %s30_s16 = int_to_ptr.vmem [resolvable:$true] %s29_s16 }
   0x4   :  { %32 = dma.hbm_to_vmem [thread:$0]  %s28_s14, 32, %s30_s16, [#allocation6]  }
   0x5   :  { %s18_s21 = sshll.u32 %s208_s20, 4  ;;  %s38_s24 = sshll.u32 %s245_s2, 4  ;;  %s19_s21 = int_to_ptr.vmem [resolvable:$true] %s18_s21  ;;  %s39_s24 = int_to_ptr.hbm [resolvable:$true] %s38_s24 }
   0x6   :  { %21 = dma.hbm_to_vmem [thread:$0]  %s17_s19, 128, %s19_s21, [#allocation3]  }
   0x7   :  { %s209_s1 = smov [#allocation7]  }
   0x8   :  { %s40_s25 = sshll.u32 %s209_s1, 4  ;;  %s41_s25 = int_to_ptr.vmem [resolvable:$true] %s40_s25 }
   0x9   :  { %43 = dma.hbm_to_vmem [thread:$0]  %s39_s24, 128, %s41_s25, [#allocation6]  }
   0xa   :  { %201 = dma.done.wait [#allocation3], 128  }
   0xb   :  { %202 = vsyncadd [#allocation3], 4294967168 }
   0xc   :  { %203 = dma.done.wait [#allocation6], 160  }
   0xd   :  { %204 = vsyncadd [#allocation6], 4294967136  ;;  %v56_v0 = vld [vmem:[#allocation2] sm:$0xff]  ;;  %v99_v1 = vld [vmem:[#allocation5] ss:$0 sm:$0xff]  ;;  %s210_s0 = smov [#allocation8]  }
   0xe   :  { %v100_v2 = vld [vmem:[#allocation5 + $0x1] ss:$0 sm:$0xff]  ;;  %v59_v3 = vmul.f32 %v99_v1, %v56_v0  ;;  %v73_v10 = vld [vmem:[#allocation7] sm:$0xff]  ;;  %s82_s2 = sshll.u32 %s210_s0, 4  ;;  %s84_s28 = sshll.u32 %s246_s3, 4  ;;  %s83_s2 = int_to_ptr.vmem [resolvable:$true] %s82_s2  ;;  %s85_s28 = int_to_ptr.hbm [resolvable:$true] %s84_s28 }
   0xf   :  { %vm74_vm0 = vcmp.ne.s32.totalorder %v73_v10, 0 }
  0x10   :  { %v62_v4 = vadd.f32 %v100_v2, %v59_v3 }
  0x12   :  { %63 = vmax.xlane.f32.xlu0 %v62_v4 }
  0x85   :  { %v64_v5 = vpop.xlane.xlu0 %63 }
  0x86   :  { %v65_v6 = vsub.f32 %v62_v4, %v64_v5 }
  0x88   :  { %v66_v7 = vmul.f32 1.442695, %v65_v6 }
  0x8a   :  { %101 = vpow2.f32 %v66_v7 }
  0x90   :  { %v102_v8 = vpop.eup %101 }
  0x91   :  { %68 = vadd.xlane.f32.xlu0 %v102_v8 }
 0x104   :  { %v69_v9 = vpop.xlane.xlu0 %68 }
 0x105   :  { %103 = vlog2.f32 %v69_v9 }
 0x10b   :  { %v104_v11 = vpop.eup %103 }
 0x10c   :  { %v71_v12 = vmul.f32 0.6931472, %v104_v11 }
 0x10e   :  { %v72_v13 = vsub.f32 %v65_v6, %v71_v12 }
 0x110   :  { %v75_v14 = vsel %vm74_vm0, -1e+08, %v72_v13 }
 0x111   :  { %76 = vst [vmem:[#allocation8] sm:$0xff] %v75_v14 }
 0x112   :  { %87 = dma.vmem_to_hbm [thread:$0]  %s83_s2, 128, %s85_s28, [#allocation4]  }
 0x113   :  { %205 = dma.done.wait [#allocation4], 128  }
 0x114   :  { %206 = vsyncadd [#allocation4], 4294967168 }
 0x115   :  { %92 = vsyncpa [#allocation3], 1 }
 0x116   :  { %93 = vsyncpa [#allocation6], 1 }
 0x117   :  { %94 = vsyncpa [#allocation4], 1 }

</bundles_post_ra>
